<compile_context>
chip_gen: v5e
topology: v5e:2x2
jax: 0.10.0
libtpu: 0.0.40
codegen_flags: <defaults>
</compile_context>

<pallas_src>
import functools

import jax
import jax.numpy as jnp
from jax import lax
from jax.experimental import pallas as pl
from jax.experimental.pallas import tpu as pltpu


def _round_up(x, m):
    return ((x + m - 1) // m) * m


# --------------------------- pass 1: global max of h2 -------------------------
def _gmax_kernel(pts_ref, w1_ref, b1_ref, w2_ref, b2_ref, gmax_ref,
                 *, n_valid, tile_n, tiles_per_split, mask_rows):
    s = pl.program_id(1)          # reduction split (dual-TC path when B == 1)
    t = pl.program_id(2)          # tile within split (reduction axis)

    @pl.when(t == 0)
    def _():
        gmax_ref[...] = jnp.full_like(gmax_ref, -jnp.inf)

    x = pts_ref[...]                                                 # (tN, C_pad) bf16
    h1 = jnp.dot(x, w1_ref[...], preferred_element_type=jnp.float32) + b1_ref[...]
    h1 = jnp.maximum(h1, 0.0)
    h2 = jnp.dot(h1.astype(jnp.bfloat16), w2_ref[...],
                 preferred_element_type=jnp.float32) + b2_ref[...]
    h2 = jnp.maximum(h2, 0.0)                                        # (tN, H2) f32

    if mask_rows:
        # Only emitted when N was padded: pad rows must not win the max.
        tile_start = (s * tiles_per_split + t) * tile_n
        row = tile_start + lax.broadcasted_iota(jnp.int32, (tile_n, 1), 0)
        h2 = jnp.where(row < n_valid, h2, -jnp.inf)

    tile_max = jnp.max(h2, axis=0, keepdims=True)                    # (1, H2)
    gmax_ref[...] = jnp.maximum(gmax_ref[...], tile_max)


# ------------------------ pass 2: per-point features ---------------------------
def _feature_kernel(pts_ref, gterm_ref, w1_ref, b1_ref, w2_ref, b2_ref,
                    w3l_ref, out_ref):
    x = pts_ref[...]                                                 # (tN, C_pad) bf16
    h1 = jnp.dot(x, w1_ref[...], preferred_element_type=jnp.float32) + b1_ref[...]
    h1 = jnp.maximum(h1, 0.0)
    h2 = jnp.dot(h1.astype(jnp.bfloat16), w2_ref[...],
                 preferred_element_type=jnp.float32) + b2_ref[...]
    h2 = jnp.maximum(h2, 0.0)                                        # (tN, H2) f32

    # gterm = gmax @ w3_global + b3 is computed once per batch in the wrapper.
    h3 = jnp.dot(h2.astype(jnp.bfloat16), w3l_ref[...],
                 preferred_element_type=jnp.float32) + gterm_ref[...]
    h3 = jnp.maximum(h3, 0.0)                                        # (tN, H_out) f32

    # Channels-first tile written directly; cast before the transpose so the XLU
    # moves half the vregs when the output dtype is bf16.
    out_ref[...] = jnp.transpose(h3.astype(out_ref.dtype), (1, 0))


# ------------------------------- wrapper ---------------------------------------
def enhanced_net_forward(points, params, mode="normal", out_dtype=jnp.bfloat16):
    """Mirrors EnhancedNet.forward: returns a dict with backbone outputs.

    points: (B, N, 3 + input_feature_dim) float32
    """
    data_dict = {}
    if mode == "gt":
        return data_dict

    data_dict["point_clouds"] = points

    B, N, C_in = points.shape
    w1, b1, w2, b2, w3, b3 = (params["w1"], params["b1"], params["w2"],
                              params["b2"], params["w3"], params["b3"])
    H1 = w1.shape[1]
    H2 = w2.shape[1]
    H_out = w3.shape[1]

    f32, bf16 = jnp.float32, jnp.bfloat16

    # ---- lane/sublane padding (zero padding -> numerically identical) ----
    C_pad = _round_up(C_in, 8)          # 27 -> 32
    H1_pad = _round_up(H1, 128)         # 64 -> 128

    # ---- N tiling (large tiles amortize per-grid-step overhead) ----
    max_tile = 4096
    tile_n = N if N <= max_tile else max_tile
    n_tiles = pl.cdiv(N, tile_n)
    # v7x: when B == 1 pass 1 has no parallel work for the second TensorCore;
    # split the reduction into two halves and combine partial maxima outside.
    n_split = 2 if (B < 2 and n_tiles >= 2) else 1
    tiles_per_split = pl.cdiv(n_tiles, n_split)
    n_tiles = n_split * tiles_per_split
    N_pad = n_tiles * tile_n

    # The pad already materializes a copy; store it in bf16 (halves read traffic).
    pts = jnp.pad(points, ((0, 0), (0, N_pad - N), (0, C_pad - C_in))).astype(bf16)

    # bf16 MXU operands (weights); biases stay f32 for the VPU epilogue.
    w1p = jnp.pad(w1, ((0, C_pad - C_in), (0, H1_pad - H1))).astype(bf16)
    b1p = jnp.pad(b1, ((0, 0), (0, H1_pad - H1))).astype(f32)
    w2p = jnp.pad(w2, ((0, H1_pad - H1), (0, 0))).astype(bf16)
    b2p = b2.astype(f32)
    # Concat order in the reference path is [h2 (local), g (global)] -> split rows:
    w3_local = w3[:H2].astype(bf16)

    cparams_reduce = pltpu.CompilerParams(
        dimension_semantics=("parallel", "parallel", "arbitrary"),
        vmem_limit_bytes=32 * 1024 * 1024)
    cparams_parallel = pltpu.CompilerParams(
        dimension_semantics=("parallel", "parallel"),
        vmem_limit_bytes=32 * 1024 * 1024)

    # ---- pass 1: per-batch (per-split) global max over points of h2 ----
    gmax_parts = pl.pallas_call(
        functools.partial(_gmax_kernel, n_valid=N, tile_n=tile_n,
                          tiles_per_split=tiles_per_split,
                          mask_rows=(N_pad != N)),
        out_shape=jax.ShapeDtypeStruct((B * n_split, 1, H2), f32),
        grid_spec=pltpu.PrefetchScalarGridSpec(
            num_scalar_prefetch=0,
            grid=(B, n_split, tiles_per_split),
            in_specs=[
                pl.BlockSpec((None, tile_n, C_pad),
                             lambda b, s, t: (b, s * tiles_per_split + t, 0)),
                pl.BlockSpec((C_pad, H1_pad), lambda b, s, t: (0, 0)),
                pl.BlockSpec((1, H1_pad), lambda b, s, t: (0, 0)),
                pl.BlockSpec((H1_pad, H2), lambda b, s, t: (0, 0)),
                pl.BlockSpec((1, H2), lambda b, s, t: (0, 0)),
            ],
            out_specs=pl.BlockSpec((None, 1, H2),
                                   lambda b, s, t: (b * n_split + s, 0, 0)),
        ),
        compiler_params=cparams_reduce,
    )(pts, w1p, b1p, w2p, b2p)

    # Combine partial maxima and hoist the global term (tiny per-batch GEMM, f32).
    gmax = jnp.max(gmax_parts.reshape(B, n_split, H2), axis=1)        # (B, H2)
    gterm = (gmax @ w3[H2:].astype(f32) + b3.astype(f32)).reshape(B, 1, H_out)

    # ---- pass 2: per-point features, channels-first output ----
    feat_cf = pl.pallas_call(
        _feature_kernel,
        out_shape=jax.ShapeDtypeStruct((B, H_out, N_pad), out_dtype),
        grid_spec=pltpu.PrefetchScalarGridSpec(
            num_scalar_prefetch=0,
            grid=(B, n_tiles),
            in_specs=[
                pl.BlockSpec((None, tile_n, C_pad), lambda b, t: (b, t, 0)),
                pl.BlockSpec((None, 1, H_out), lambda b, t: (b, 0, 0)),
                pl.BlockSpec((C_pad, H1_pad), lambda b, t: (0, 0)),
                pl.BlockSpec((1, H1_pad), lambda b, t: (0, 0)),
                pl.BlockSpec((H1_pad, H2), lambda b, t: (0, 0)),
                pl.BlockSpec((1, H2), lambda b, t: (0, 0)),
                pl.BlockSpec((H2, H_out), lambda b, t: (0, 0)),
            ],
            out_specs=pl.BlockSpec((None, H_out, tile_n), lambda b, t: (b, 0, t)),
        ),
        compiler_params=cparams_parallel,
    )(pts, gterm, w1p, b1p, w2p, b2p, w3_local)

    if N_pad != N:
        feat_cf = feat_cf[:, :, :N]

    data_dict["fp2_features"] = feat_cf                  # (B, H_out, N), channels-first
    data_dict["fp2_xyz"] = points[:, :, :3]
    data_dict["fp2_inds"] = jnp.broadcast_to(
        jnp.arange(N, dtype=jnp.int32)[None, :], (B, N))
    return data_dict


# --------------------------- reference (pure JAX) -------------------------------
def _reference_forward(points, params):
    x = points.astype(jnp.float32)
    h1 = jnp.maximum(x @ params["w1"] + params["b1"], 0.0)
    h2 = jnp.maximum(h1 @ params["w2"] + params["b2"], 0.0)
    g = jnp.max(h2, axis=1, keepdims=True)
    g_b = jnp.broadcast_to(g, h2.shape)
    cat = jnp.concatenate([h2, g_b], axis=-1)
    h3 = jnp.maximum(cat @ params["w3"] + params["b3"], 0.0)
    return jnp.transpose(h3, (0, 2, 1))                  # (B, H_out, N)


def init_params(key, c_in=27, h1=64, h2=128, h_out=128):
    k1, k2, k3 = jax.random.split(key, 3)
    scale = 0.05
    return {
        "w1": scale * jax.random.normal(k1, (c_in, h1), jnp.float32),
        "b1": jnp.zeros((1, h1), jnp.float32),
        "w2": scale * jax.random.normal(k2, (h1, h2), jnp.float32),
        "b2": jnp.zeros((1, h2), jnp.float32),
        "w3": scale * jax.random.normal(k3, (2 * h2, h_out), jnp.float32),
        "b3": jnp.zeros((1, h_out), jnp.float32),
    }


if __name__ == "__main__":
    key = jax.random.PRNGKey(0)
    kx, kp = jax.random.split(key)

    B, N = 2, 64
    input_feature_dim = 24
    C_in = 3 + input_feature_dim  # 27

    points = jax.random.normal(kx, (B, N, C_in), jnp.float32)
    params = init_params(kp, c_in=C_in)

    out = enhanced_net_forward(points, params, mode="normal")
    jax.block_until_ready(out["fp2_features"])

    assert out["point_clouds"].shape == (B, N, C_in)
    assert out["fp2_features"].shape == (B, 128, N)
    assert out["fp2_xyz"].shape == (B, N, 3)
    assert out["fp2_inds"].shape == (B, N)

    # Numerical check vs. pure-JAX f32 reference (kernel uses bf16 MXU operands and a
    # bf16 writeback, so a loose tolerance is expected).
    ref = _reference_forward(points, params)
    max_err = float(jnp.max(jnp.abs(out["fp2_features"].astype(jnp.float32) - ref)))
    assert max_err < 3e-2, f"max abs error too large: {max_err}"

    print("KERNEL_OK")
</pallas_src>

<mosaic_0001>
module attributes {stable_mosaic.version = 11 : i64} {
  func.func @_gmax_kernel(%arg0: i32, %arg1: i32, %arg2: i32, %arg3: memref<1x64x32xbf16, #tpu.memory_space<vmem>>, %arg4: memref<32x128xbf16, #tpu.memory_space<vmem>>, %arg5: memref<1x128xf32, #tpu.memory_space<vmem>>, %arg6: memref<128x128xbf16, #tpu.memory_space<vmem>>, %arg7: memref<1x128xf32, #tpu.memory_space<vmem>>, %arg8: memref<1x1x128xf32, #tpu.memory_space<vmem>>) attributes {dimension_semantics = [#tpu.dimension_semantics<parallel>, #tpu.dimension_semantics<parallel>, #tpu.dimension_semantics<arbitrary>], iteration_bounds = array<i64: 2, 1, 1>, scalar_prefetch = 0 : i64, scratch_operands = 0 : i64, tpu.core_type = #tpu.core_type<tc>, window_params = [{transform_indices = @transform_0, window_bounds = array<i64: 1, 64, 32>}, {pipeline_mode = #tpu.pipeline_mode<synchronous>, transform_indices = @transform_1, window_bounds = array<i64: 32, 128>}, {pipeline_mode = #tpu.pipeline_mode<synchronous>, transform_indices = @transform_2, window_bounds = array<i64: 1, 128>}, {pipeline_mode = #tpu.pipeline_mode<synchronous>, transform_indices = @transform_3, window_bounds = array<i64: 128, 128>}, {pipeline_mode = #tpu.pipeline_mode<synchronous>, transform_indices = @transform_4, window_bounds = array<i64: 1, 128>}, {transform_indices = @transform_5, window_bounds = array<i64: 1, 1, 128>}]} {
    %c0_i32 = arith.constant 0 : i32
    %0 = arith.cmpi eq, %arg2, %c0_i32 : i32
    %1 = arith.extui %0 : i1 to i32
    %c0_i32_0 = arith.constant 0 : i32
    %2 = arith.cmpi ne, %1, %c0_i32_0 : i32
    scf.if %2 {
      %cst_21 = arith.constant 0xFF800000 : f32
      %28 = vector.broadcast %cst_21 : f32 to vector<1x128xf32>
      %c0_22 = arith.constant 0 : index
      %c0_23 = arith.constant 0 : index
      %c0_24 = arith.constant 0 : index
      %29 = vector.load %arg8[%c0_22, %c0_23, %c0_24] : memref<1x1x128xf32, #tpu.memory_space<vmem>>, vector<1x1x128xf32>
      %30 = vector.shape_cast %29 : vector<1x1x128xf32> to vector<1x128xf32>
      %31 = vector.shape_cast %28 : vector<1x128xf32> to vector<1x1x128xf32>
      tpu.vector_store %arg8[%c0_22, %c0_23, %c0_24], %31 {strides = array<i32>} : memref<1x1x128xf32, #tpu.memory_space<vmem>>, vector<1x1x128xf32>,
    } else {
    }
    %c0 = arith.constant 0 : index
    %c0_1 = arith.constant 0 : index
    %c0_2 = arith.constant 0 : index
    %3 = vector.load %arg3[%c0, %c0_1, %c0_2] : memref<1x64x32xbf16, #tpu.memory_space<vmem>>, vector<1x64x32xbf16>
    %4 = vector.shape_cast %3 : vector<1x64x32xbf16> to vector<64x32xbf16>
    %c0_3 = arith.constant 0 : index
    %c0_4 = arith.constant 0 : index
    %5 = vector.load %arg4[%c0_3, %c0_4] : memref<32x128xbf16, #tpu.memory_space<vmem>>, vector<32x128xbf16>
    %cst = arith.constant dense<0.000000e+00> : vector<64x128xf32>
    %6 = tpu.matmul %4, %5, %cst {dimension_numbers = #tpu.dot_dimension_numbers<[1], [0], [0], [1], [0, 0, 1, 1], [], []>} : vector<64x32xbf16>, vector<32x128xbf16>, vector<64x128xf32> -> vector<64x128xf32>
    %c0_5 = arith.constant 0 : index
    %c0_6 = arith.constant 0 : index
    %7 = vector.load %arg5[%c0_5, %c0_6] : memref<1x128xf32, #tpu.memory_space<vmem>>, vector<1x128xf32>
    %8 = vector.broadcast %7 : vector<1x128xf32> to vector<64x128xf32>
    %9 = arith.addf %6, %8 : vector<64x128xf32>
    %cst_7 = arith.constant 0.000000e+00 : f32
    %10 = vector.broadcast %cst_7 : f32 to vector<64x128xf32>
    %11 = arith.maximumf %9, %10 : vector<64x128xf32>
    %12 = arith.truncf %11 : vector<64x128xf32> to vector<64x128xbf16>
    %c0_8 = arith.constant 0 : index
    %c0_9 = arith.constant 0 : index
    %13 = vector.load %arg6[%c0_8, %c0_9] : memref<128x128xbf16, #tpu.memory_space<vmem>>, vector<128x128xbf16>
    %cst_10 = arith.constant dense<0.000000e+00> : vector<64x128xf32>
    %14 = tpu.matmul %12, %13, %cst_10 {dimension_numbers = #tpu.dot_dimension_numbers<[1], [0], [0], [1], [0, 0, 1, 1], [], []>} : vector<64x128xbf16>, vector<128x128xbf16>, vector<64x128xf32> -> vector<64x128xf32>
    %c0_11 = arith.constant 0 : index
    %c0_12 = arith.constant 0 : index
    %15 = vector.load %arg7[%c0_11, %c0_12] : memref<1x128xf32, #tpu.memory_space<vmem>>, vector<1x128xf32>
    %16 = vector.broadcast %15 : vector<1x128xf32> to vector<64x128xf32>
    %17 = arith.addf %14, %16 : vector<64x128xf32>
    %cst_13 = arith.constant 0.000000e+00 : f32
    %18 = vector.broadcast %cst_13 : f32 to vector<64x128xf32>
    %19 = arith.maximumf %17, %18 : vector<64x128xf32>
    %cst_14 = arith.constant dense<0xFF800000> : vector<128xf32>
    %20 = vector.multi_reduction <maximumf>, %19, %cst_14 [0] : vector<64x128xf32> to vector<128xf32>
    %21 = vector.shape_cast %20 : vector<128xf32> to vector<1x128xf32>
    %c0_15 = arith.constant 0 : index
    %c0_16 = arith.constant 0 : index
    %c0_17 = arith.constant 0 : index
    %22 = vector.load %arg8[%c0_15, %c0_16, %c0_17] : memref<1x1x128xf32, #tpu.memory_space<vmem>>, vector<1x1x128xf32>
    %23 = vector.shape_cast %22 : vector<1x1x128xf32> to vector<1x128xf32>
    %24 = arith.maximumf %23, %21 : vector<1x128xf32>
    %c0_18 = arith.constant 0 : index
    %c0_19 = arith.constant 0 : index
    %c0_20 = arith.constant 0 : index
    %25 = vector.load %arg8[%c0_18, %c0_19, %c0_20] : memref<1x1x128xf32, #tpu.memory_space<vmem>>, vector<1x1x128xf32>
    %26 = vector.shape_cast %25 : vector<1x1x128xf32> to vector<1x128xf32>
    %27 = vector.shape_cast %24 : vector<1x128xf32> to vector<1x1x128xf32>
    tpu.vector_store %arg8[%c0_18, %c0_19, %c0_20], %27 {strides = array<i32>} : memref<1x1x128xf32, #tpu.memory_space<vmem>>, vector<1x1x128xf32>,
    return
  }
  func.func @transform_0(%arg0: i32, %arg1: i32, %arg2: i32) -> (i32, i32, i32) {
    %c1_i32 = arith.constant 1 : i32
    %0 = arith.muli %arg1, %c1_i32 : i32
    %1 = arith.addi %0, %arg2 : i32
    %c0_i32 = arith.constant 0 : i32
    %c0_i32_0 = arith.constant 0 : i32
    return %arg0, %1, %c0_i32 : i32, i32, i32
  }
  func.func @transform_1(%arg0: i32, %arg1: i32, %arg2: i32) -> (i32, i32) {
    %c0_i32 = arith.constant 0 : i32
    %c0_i32_0 = arith.constant 0 : i32
    %c0_i32_1 = arith.constant 0 : i32
    return %c0_i32, %c0_i32_0 : i32, i32
  }
  func.func @transform_2(%arg0: i32, %arg1: i32, %arg2: i32) -> (i32, i32) {
    %c0_i32 = arith.constant 0 : i32
    %c0_i32_0 = arith.constant 0 : i32
    %c0_i32_1 = arith.constant 0 : i32
    return %c0_i32, %c0_i32_0 : i32, i32
  }
  func.func @transform_3(%arg0: i32, %arg1: i32, %arg2: i32) -> (i32, i32) {
    %c0_i32 = arith.constant 0 : i32
    %c0_i32_0 = arith.constant 0 : i32
    %c0_i32_1 = arith.constant 0 : i32
    return %c0_i32, %c0_i32_0 : i32, i32
  }
  func.func @transform_4(%arg0: i32, %arg1: i32, %arg2: i32) -> (i32, i32) {
    %c0_i32 = arith.constant 0 : i32
    %c0_i32_0 = arith.constant 0 : i32
    %c0_i32_1 = arith.constant 0 : i32
    return %c0_i32, %c0_i32_0 : i32, i32
  }
  func.func @transform_5(%arg0: i32, %arg1: i32, %arg2: i32) -> (i32, i32, i32) {
    %c1_i32 = arith.constant 1 : i32
    %0 = arith.muli %arg0, %c1_i32 : i32
    %1 = arith.addi %0, %arg1 : i32
    %c0_i32 = arith.constant 0 : i32
    %c0_i32_0 = arith.constant 0 : i32
    %c0_i32_1 = arith.constant 0 : i32
    return %1, %c0_i32, %c0_i32_0 : i32, i32, i32
  }
}

</mosaic_0001>

<bundles_post_ra>
// kernel: tpu_custom_call.1
= control target key start
LH: loop header
LB: loop body
LE: loop exit
PB: predicated region body
PF: predicated region fallthrough
CT: control target
= control target key end

     0   :  { %10 = vsyncpa [#allocation3], 0  ;;  %s1001_s0 = inlined_call_operand.vmem [shape: bf16[2,64,32], index: 0, kind: input, shape index: {}]   ;;  %s1002_s1 = inlined_call_operand.vmem [shape: bf16[32,128], index: 1, kind: input, shape index: {}]   ;;  %s1003_s2 = inlined_call_operand.vmem [shape: f32[1,128], index: 2, kind: input, shape index: {}]   ;;  %s1004_s3 = inlined_call_operand.vmem [shape: bf16[128,128], index: 3, kind: input, shape index: {}]   ;;  %s1005_s4 = inlined_call_operand.vmem [shape: f32[1,128], index: 4, kind: input, shape index: {}]   ;;  %s1006_s5 = inlined_call_operand.hbm [shape: f32[2,1,128], index: 5, kind: output, shape index: {}]  }
   0x1   :  { %12 = vsyncpa [#allocation3 + $0x1], 0  ;;  %s854_s18 = smov 0   ;;  %s856_s19 = smov 0  }
   0x2   :  { %s858_s20 = smov 0   ;;  %s860_s21 = smov 0  }
   0x3   :  { %s862_s22 = smov 0   ;;  %s864_s23 = smov 0  }
   0x4 LB: > { %s583_s24 = sadd.s32 4294967295, %s821_s23   ;;  %s584_s25 = sadd.s32 4294967294, %s821_s23   ;;  %s821_s23 = sphi %s864_s23, %s18_s23   ;;  %s817_s22 = sphi %s862_s22, %s1013_s22   ;;  %s813_s21 = sphi %s860_s21, %s1012_s21   ;;  %s809_s20 = sphi %s858_s20, %s1011_s20   ;;  %s805_s19 = sphi %s856_s19, %s1010_s19   ;;  %s801_s18 = sphi %s854_s18, %s1009_s18  }
   0x5   : > { %s37_s26 = sadd.s32 1, %s817_s22  ;;  %s160_s27 = sadd.s32 1, %s809_s20 }
   0x6   : > { %p39_p0 = scmp.ge.s32.totalorder %s37_s26, 2  ;;  %p170_p1 = scmp.ne.s32.totalorder %s809_s20, %s805_s19 }
   0x7   : > { %p171_p2 = scmp.eq.s32.totalorder %s583_s24, 1  ;;  %p176_p3 = scmp.ne.s32.totalorder %s805_s19, %s801_s18 }
   0x8   : > { %s1015_s26 = smov (%p39_p0, %s37_s26), 0  ;;  %p177_p5 = scmp.eq.s32.totalorder %s584_s25, 1 }
   0x9   : > { %p894_p4 = por %p171_p2, %p170_p1  ;;  %s157_s29 = ssub.s32 %s817_s22, %s1015_s26 }
   0xa   : > { %p587_p6 = scmp.ge.s32.totalorder %s821_s23, 1  ;;  %p158_p7 = scmp.eq.s32.totalorder %s157_s29, 0 }
   0xb   : > { %p901_p8 = por %p177_p5, %p176_p3  ;;  %p222_p9 = scmp.lt.s32.totalorder %s821_s23, 3 }
   0xc   : > { %s907_s6 = scalar_select %p158_p7, %s809_s20, %s160_s27  }
   0xd   : > { %p223_p10 = pnand %p587_p6, %p222_p9 }
   0xe   : > { %p256_p11 = scmp.lt.s32.totalorder (!%p223_p10), %s813_s21, 1  ;;  %s252_s25 = sand.u32 (!%p223_p10), 1, %s805_s19  }
   0xf   : > { %226 = sbr.rel (%p223_p10) target bundleno = 373 (0x175), region = 40  ;;  %s954_s27 = scalar_lea.vmem (!%p223_p10), [#allocation2], %s252_s25 }
  0x10   : > { %s506_s10 = scalar_lea.hbm (!%p223_p10), %s1006_s5, %s813_s21  ;;  %s497_s13 = scalar_lea.sflag (!%p223_p10), [#allocation3], %s252_s25 }
  0x11   : > { %s763_s17 = scalar_lea.hbm (!%p223_p10), %s1006_s5, 2 }
  0x14   : > { %v658_v0 = vld [vmem:[%s1002_s1 + $0x8] sm:$0xff]  ;;  %v657_v1 = vld [vmem:[%s1002_s1] sm:$0xff]  ;;  %s257_s11 = scalar_select %p256_p11, %s813_s21, 1  ;;  %vm321_vm0 = vcmask 261120   ;;  %v666_v4 = vld [vmem:[%s1004_s3 + $0x38] sm:$0xff]  ;;  %v823_v45 = vmov -inf  }
  0x15   : > { %667 = vmatpush.bf16.msra.mxu3 %v658_v0  ;;  %340 = vmatpush.bf16.msra.mxu0 %v658_v0  ;;  %v665_v5 = vld [vmem:[%s1004_s3 + $0x30] sm:$0xff]  ;;  %v664_v6 = vld [vmem:[%s1004_s3 + $0x28] sm:$0xff]  ;;  %v663_v7 = vld [vmem:[%s1004_s3 + $0x20] sm:$0xff]  ;;  %272 = vst [vmem:[%s954_s27] sm:$0x1] %v823_v45 }
  0x16   : > { %s652_s12 = sshll.u32 %s257_s11, 5  ;;  %669 = vmatpush.bf16.msra.mxu1 %v666_v4  ;;  %670 = vmatpush.bf16.msra.mxu2 %v666_v4  ;;  %v662_v10 = vld [vmem:[%s1004_s3 + $0x18] sm:$0xff]  ;;  %v661_v11 = vld [vmem:[%s1004_s3 + $0x10] sm:$0xff]  ;;  %v660_v12 = vld [vmem:[%s1004_s3 + $0x8] sm:$0xff]  ;;  %s508_s11 = sshll.u32 %s954_s27, 4  ;;  %s509_s11 = int_to_ptr.vmem [resolvable:$true] %s508_s11 }
  0x17   : > { %s263_s15 = scalar_lea.vmem %s1001_s0, %s652_s12  ;;  %v659_v13 = vld [vmem:[%s1004_s3] sm:$0xff]  ;;  %s510_s12 = sshll.u32 %s506_s10, 4  ;;  %s511_s12 = int_to_ptr.hbm [resolvable:$true] %s510_s12 }
  0x18   : > { %v654_v2 = vld [vmem:[%s263_s15 + $0x8] sm:$0xff]  ;;  %v653_v3 = vld [vmem:[%s263_s15] sm:$0xff]  ;;  %v655_v8 = vld [vmem:[%s263_s15 + $0x10] sm:$0xff]  ;;  %s757_s14 = sshra.s32 %s511_s12, 4  ;;  %s758_s14 = int_to_ptr.hbm [resolvable:$true] %s757_s14 }
  0x19   : > { %668 = vmatpush.bf16.msra.mxu3 %v657_v1  ;;  %341 = vmatpush.bf16.msra.mxu0 %v657_v1  ;;  %v656_v9 = vld [vmem:[%s263_s15 + $0x18] sm:$0xff]  ;;  %v741_v15 = vld [vmem:[%s1003_s2] ss:$0 sm:$0xff]  ;;  %s759_s15 = scalar_lea.hbm %s758_s14, 1  ;;  %p764_p1 = scmp.lt.s32.totalorder %s758_s14, %s1006_s5 }
  0x1a   : > { %671 = vmatpush.bf16.msra.mxu1 %v665_v5  ;;  %672 = vmatpush.bf16.msra.mxu2 %v665_v5  ;;  %v742_v50 = vld [vmem:[%s1005_s4] ss:$0 sm:$0xff]  ;;  %p760_p12 = scmp.ne.s32.totalorder %s758_s14, %s759_s15  ;;  %p765_p2 = scmp.lt.s32.totalorder %s763_s17, %s759_s15 }
  0x1c   : > { %615 = vmatmul.msk.bf16.vlgmr.msra.gmra.mxu3 %vm321_vm0, %v654_v2  ;;  %614 = vmatmul.msk.bf16.vlgmr.msra.gmra.mxu0 %vm321_vm0, %v653_v3  ;;  %p761_p13 = pnand %p760_p12, %p894_p4  ;;  %p766_p3 = por %p765_p2, %p764_p1 }
  0x1d   : > { %443 = vmatpush.bf16.msrb.mxu0 %v666_v4 }
  0x1e   : > { %673 = vmatpush.bf16.msra.mxu1 %v664_v6  ;;  %674 = vmatpush.bf16.msra.mxu2 %v664_v6  ;;  %p762_p0 = pneg %p761_p13 }
  0x20   : > { %p767_p5 = pnand %p766_p3, %p762_p0 }
  0x21   : > { %444 = vmatpush.bf16.msrb.mxu0 %v665_v5 }
  0x22   : > { %675 = vmatpush.bf16.msra.mxu1 %v663_v7  ;;  %676 = vmatpush.bf16.msra.mxu2 %v663_v7 }
  0x25   : > { %445 = vmatpush.bf16.msrb.mxu0 %v664_v6 }
  0x26   : > { %677 = vmatpush.bf16.msra.mxu1 %v662_v10  ;;  %678 = vmatpush.bf16.msra.mxu2 %v662_v10 }
  0x29   : > { %446 = vmatpush.bf16.msrb.mxu0 %v663_v7 }
  0x2a   : > { %679 = vmatpush.bf16.msra.mxu1 %v661_v11  ;;  %680 = vmatpush.bf16.msra.mxu2 %v661_v11 }
  0x2c   : > { %616 = vmatmul.msk.bf16.gmra.mxu3 %vm321_vm0, %v655_v8 }
  0x2d   : > { %447 = vmatpush.bf16.msrb.mxu0 %v662_v10 }
  0x2e   : > { %681 = vmatpush.bf16.msra.mxu1 %v660_v12  ;;  %682 = vmatpush.bf16.msra.mxu2 %v660_v12 }
  0x31   : > { %448 = vmatpush.bf16.msrb.mxu0 %v661_v11 }
  0x32   : > { %683 = vmatpush.bf16.msra.mxu1 %v659_v13  ;;  %684 = vmatpush.bf16.msra.mxu2 %v659_v13 }
  0x35   : > { %449 = vmatpush.bf16.msrb.mxu0 %v660_v12 }
  0x39   : > { %450 = vmatpush.bf16.msrb.mxu0 %v659_v13 }
  0x3c   : > { %617 = vmatmul.msk.bf16.gmra.mxu3 %vm321_vm0, %v656_v9 }
  0x99   : > { %v343_v14 = vpop.f32.mrf.mxu0 }
  0x9a   : > { %v344_v16 = vadd.f32 %v741_v15, %v343_v14 }
  0x9c   : > { %v363_v19 = vmax.f32 %v344_v16, 0.0 }
  0x9f   : > { %v348_v17 = vpop.f32.mrf.mxu3 }
  0xa0   : > { %v349_v22 = vadd.f32 %v741_v15, %v348_v17  ;;  %v493_v17 = vld [vmem:[%s954_s27] sm:$0x1] }
  0xa1   : > { %v345_v18 = vpop.f32.mrf.mxu0 }
  0xa2   : > { %v346_v20 = vadd.f32 %v741_v15, %v345_v18  ;;  %v365_v26 = vmax.f32 %v349_v22, 0.0 }
  0xa4   : > { %v364_v21 = vmax.f32 %v346_v20, 0.0 }
  0xa6   : > { %v371_v23 = vpack.c.bf16 %v364_v21, %v363_v19 }
  0xa7   : > { %v350_v24 = vpop.f32.mrf.mxu3 }
  0xa8   : > { %v351_v25 = vadd.f32 %v741_v15, %v350_v24  ;;  %451 = vmatmul.bf16.vlgmr.msrb.gmra.mxu0 %v371_v23 }
  0xaa   : > { %v366_v27 = vmax.f32 %v351_v25, 0.0 }
  0xac   : > { %v372_v28 = vpack.c.bf16 %v366_v27, %v365_v26 }
  0xae   : > { %456 = vmatmul.bf16.vlgmr.msra.gmra.mxu1 %v372_v28 }
  0xaf   : > { %v353_v29 = vpop.f32.mrf.mxu3 }
  0xb0   : > { %v354_v30 = vadd.f32 %v741_v15, %v353_v29 }
  0xb2   : > { %v367_v33 = vmax.f32 %v354_v30, 0.0 }
  0xb7   : > { %v355_v31 = vpop.f32.mrf.mxu3 }
  0xb8   : > { %v356_v32 = vadd.f32 %v741_v15, %v355_v31 }
  0xba   : > { %v368_v34 = vmax.f32 %v356_v32, 0.0 }
  0xbc   : > { %v373_v35 = vpack.c.bf16 %v368_v34, %v367_v33 }
  0xbe   : > { %461 = vmatmul.bf16.vlgmr.msra.gmra.mxu2 %v373_v35 }
  0xbf   : > { %v358_v36 = vpop.f32.mrf.mxu3 }
  0xc0   : > { %v359_v37 = vadd.f32 %v741_v15, %v358_v36 }
  0xc2   : > { %v369_v40 = vmax.f32 %v359_v37, 0.0 }
  0xc7   : > { %v360_v38 = vpop.f32.mrf.mxu3 }
  0xc8   : > { %v361_v39 = vadd.f32 %v741_v15, %v360_v38 }
  0xca   : > { %v370_v41 = vmax.f32 %v361_v39, 0.0 }
  0xcc   : > { %v374_v42 = vpack.c.bf16 %v370_v41, %v369_v40 }
  0xce   : > { %466 = vmatmul.bf16.gmra.mxu2 %v374_v42 }
 0x125   : > { %v452_v44 = vpop.f32.mrf.mxu0 }
 0x126   : > { %v453_v54 = vadd.f32 %v742_v50, %v452_v44 }
 0x128   : > { %v472_v62 = vmax.f32 %v453_v54, 0.0 }
 0x12b   : > { %v457_v47 = vpop.f32.mrf.mxu1 }
 0x12c   : > { %v458_v57 = vadd.f32 %v742_v50, %v457_v47 }
 0x12d   : > { %v454_v48 = vpop.f32.mrf.mxu0 }
 0x12e   : > { %v455_v51 = vadd.f32 %v742_v50, %v454_v48  ;;  %v474_v2 = vmax.f32 %v458_v57, 0.0 }
 0x130   : > { %v473_v59 = vmax.f32 %v455_v51, 0.0 }
 0x133   : > { %v459_v53 = vpop.f32.mrf.mxu1 }
 0x134   : > { %v460_v58 = vadd.f32 %v742_v50, %v459_v53 }
 0x136   : > { %v475_v3 = vmax.f32 %v460_v58, 0.0 }
 0x141   : > { %v462_v43 = vpop.f32.mrf.mxu2 }
 0x142   : > { %v463_v55 = vadd.f32 %v742_v50, %v462_v43 }
 0x144   : > { %v476_v63 = vmax.f32 %v463_v55, 0.0 }
 0x146   : > { %v480_v6 = vmax.f32 %v472_v62, %v476_v63 }
 0x149   : > { %v464_v46 = vpop.f32.mrf.mxu2 }
 0x14a   : > { %v465_v52 = vadd.f32 %v742_v50, %v464_v46 }
 0x14c   : > { %v477_v60 = vmax.f32 %v465_v52, 0.0 }
 0x14e   : > { %v481_v4 = vmax.f32 %v473_v59, %v477_v60 }
 0x150   : > { %v484_v9 = vmax.f32 %v480_v6, %v481_v4 }
 0x151   : > { %v467_v49 = vpop.f32.mrf.mxu2 }
 0x152   : > { %v468_v56 = vadd.f32 %v742_v50, %v467_v49 }
 0x154   : > { %v478_v0 = vmax.f32 %v468_v56, 0.0 }
 0x156   : > { %v482_v7 = vmax.f32 %v474_v2, %v478_v0 }
 0x159   : > { %v469_v61 = vpop.f32.mrf.mxu2 }
 0x15a   : > { %v470_v1 = vadd.f32 %v742_v50, %v469_v61 }
 0x15c   : > { %v479_v5 = vmax.f32 %v470_v1, 0.0 }
 0x15e   : > { %v483_v8 = vmax.f32 %v475_v3, %v479_v5 }
 0x160   : > { %v485_v10 = vmax.f32 %v482_v7, %v483_v8 }
 0x162   : > { %v486_v11 = vmax.f32 %v484_v9, %v485_v10 }
 0x164   : > { %v487_v12 = vrot.slane %v486_v11, 4 }
 0x166   : > { %v488_v13 = vmax.f32 %v486_v11, %v487_v12 }
 0x168   : > { %v489_v14 = vrot.slane %v488_v13, 2 }
 0x16a   : > { %v490_v15 = vmax.f32 %v488_v13, %v489_v14 }
 0x16c   : > { %v491_v16 = vrot.slane %v490_v15, 1 }
 0x16e   : > { %v492_v18 = vmax.f32 %v490_v15, %v491_v16 }
 0x170   : > { %v494_v19 = vmax.f32 %v493_v17, %v492_v18 }
 0x172   : > { %495 = vst [vmem:[%s954_s27] sm:$0x1] %v494_v19 }
 0x173   : > { %770 = shalt.err (!%p767_p5)
}
 0x174   : > { %685 = dma.vmem_to_hbm [thread:$0]  (%p894_p4), %s509_s11, 16, %s511_s12, %s497_s13  }
 0x175 PF: > { %p691_p6 = scmp.ge.s32.totalorder %s821_s23, 2  ;;  %s522_s25 = sand.u32 1, %s801_s18  }
 0x176   : > { %s523_s27 = scalar_lea.sflag [#allocation3], %s522_s25 }
 0x177   : > { %p688_p7 = pnand %p691_p6, %p901_p8 }
 0x179   : > { %p689_p9 = pneg %p688_p7 }
 0x17b   : > { %796 = dma.done.wait (%p689_p9), %s523_s27, 16  }
 0x17c   : > { %798 = vsyncadd (%p689_p9), %s523_s27, 4294967280  ;;  %s18_s23 = sadd.s32 1, %s821_s23   ;;  %s1009_s18 = smov %s805_s19 }
 0x17d   : > { %p15_p10 = scmp.ge.s32.totalorder %s18_s23, 4   ;;  %s1010_s19 = smov %s809_s20 }
 0x17e   : > { %s1011_s20 = smov %s907_s6  ;;  %s1012_s21 = smov %s817_s22 }
 0x17f   : > { %s1013_s22 = smov %s1015_s26  ;;  %17 = sbr.rel (!%p15_p10) target bundleno = 4 (0x4), region = 79 }
 0x184   :  { %528 = vsyncpa [#allocation3], 1 }
 0x185   :  { %530 = vsyncpa [#allocation3 + $0x1], 1 }

</bundles_post_ra>
